<compile_context>
chip_gen: v7x
topology: tpu7x:2x2x1
jax: 0.10.0
libtpu: 0.0.40
codegen_flags: <defaults>
</compile_context>

<pallas_src>
import jax
import jax.numpy as jnp
from jax.experimental import pallas as pl
from jax.experimental.pallas import tpu as pltpu


# ----------------------------- kernels -------------------------------------

def _attention_body(x_ref, w_ref, b_ref, o_ref, m_ref=None):
    # x_ref: (TB, T, F) native dtype; all math in f32.
    x = x_ref[...].astype(jnp.float32)                  # (TB, T, F)
    w = w_ref[...]                                      # (1, F)  f32
    bias = b_ref[...]                                   # (1, T)  f32

    # eij[b, t] = tanh( sum_f x[b,t,f] * w[f] + bias[t] )
    eij = jnp.sum(x * w[None, :, :], axis=-1)           # VPU mul + XLU lane reduce -> (TB, T)
    eij = jnp.tanh(eij + bias)                          # EUP
    a = jnp.exp(eij)                                    # EUP
    if m_ref is not None:
        a = a * m_ref[...]                              # (TB, T)
    denom = jnp.sum(a, axis=-1, keepdims=True)          # (TB, 1)
    a_n = a / denom + 1e-10                             # exact torch op order: a/sum + eps

    # Weighted step-sum on the VPU (no M=1 MXU matmuls): (TB, T, F) -> (TB, F)
    ws = jnp.sum(x * a_n[:, :, None], axis=1)
    o_ref[...] = ws.astype(o_ref.dtype)


def attention_kernel(x_ref, w_ref, b_ref, o_ref):
    _attention_body(x_ref, w_ref, b_ref, o_ref)


def attention_kernel_masked(x_ref, w_ref, b_ref, m_ref, o_ref):
    _attention_body(x_ref, w_ref, b_ref, o_ref, m_ref)


# --------------------------- tile sizing ------------------------------------

def _round_up(v, m):
    return -(-v // m) * m


def _vmem_physical_bytes():
    try:
        return int(pltpu.get_tpu_info().vmem_capacity_bytes)
    except Exception:
        return 64 * 1024 * 1024  # assume the smallest generation (v7x: 64 MiB)


def _pick_batch_tile(b, t, f, x_itemsize, buf_budget_bytes):
    """Largest multiple-of-8 batch tile whose buffers fit the VMEM budget,
    capped so the grid keeps >= 2 steps (both v7x TensorCores get work)."""
    per_row = (2 * t * f * x_itemsize   # double-buffered x tile
               + 8 * t * f              # ~two f32 whole-tile compute temporaries
               + 8 * f)                 # double-buffered f32 output row
    tb_budget = max(8, (buf_budget_bytes // per_row) // 8 * 8)
    b8 = _round_up(b, 8)
    tb_mega = _round_up(-(-b8 // 2), 8) if b8 >= 16 else b8
    return max(8, min(tb_budget, tb_mega))


# ----------------------------- wrapper --------------------------------------

def attention_forward(x, weight, bias=None, mask=None):
    """Attention forward. x: (B, step_dim, feature_dim) -> (B, feature_dim) f32."""
    b, t, f = x.shape
    x_itemsize = x.dtype.itemsize

    w_row = weight.reshape(1, f).astype(jnp.float32)
    b_row = (jnp.zeros((1, t), jnp.float32) if bias is None
             else bias.reshape(1, t).astype(jnp.float32))

    phys_vmem = _vmem_physical_bytes()
    buf_budget = int(phys_vmem * 0.55)    # buffers: x double-buffer + temps + out
    vmem_limit = int(phys_vmem * 0.75)    # scoped limit, headroom under physical

    tb = _pick_batch_tile(b, t, f, x_itemsize, buf_budget)
    b_pad = _round_up(b, tb)
    grid = (b_pad // tb,)

    # Pad the batch so every grid step is a full aligned tile (padded zero rows
    # produce finite values and are sliced off below).
    if b_pad != b:
        x = jnp.pad(x, ((0, b_pad - b), (0, 0), (0, 0)))

    in_specs = [
        pl.BlockSpec((tb, t, f), lambda i: (i, 0, 0)),   # x batch tile (native dtype)
        pl.BlockSpec((1, f), lambda i: (0, 0)),          # weight, resident in VMEM
        pl.BlockSpec((1, t), lambda i: (0, 0)),          # bias, resident in VMEM
    ]
    args = [x, w_row, b_row]
    kernel = attention_kernel
    if mask is not None:
        m = mask.astype(jnp.float32).reshape(b, t)
        if b_pad != b:
            m = jnp.pad(m, ((0, b_pad - b), (0, 0)), constant_values=1.0)
        in_specs.append(pl.BlockSpec((tb, t), lambda i: (i, 0)))
        args.append(m)
        kernel = attention_kernel_masked

    cost = pl.CostEstimate(
        flops=4 * b_pad * t * f,              # score mul/add + weighted mul/add
        transcendentals=2 * b_pad * t,        # tanh + exp
        bytes_accessed=b_pad * t * f * x_itemsize + b_pad * f * 4,
    )

    out = pl.pallas_call(
        kernel,
        out_shape=jax.ShapeDtypeStruct((b_pad, f), jnp.float32),
        grid_spec=pltpu.PrefetchScalarGridSpec(
            num_scalar_prefetch=0,
            grid=grid,
            in_specs=in_specs,
            out_specs=pl.BlockSpec((tb, f), lambda i: (i, 0)),
        ),
        compiler_params=pltpu.CompilerParams(
            dimension_semantics=("parallel",),   # batch tiles are independent
            vmem_limit_bytes=vmem_limit,
        ),
        cost_estimate=cost,
    )(*args)
    return out[:b] if b_pad != b else out


# ---------------------------- reference -------------------------------------

def reference(x, weight, bias=None, mask=None):
    """Pure-JAX reference mirroring the PyTorch forward (f32 math)."""
    b, t, f = x.shape
    xf = x.astype(jnp.float32)
    eij = jnp.dot(xf.reshape(-1, f), weight.astype(jnp.float32)).reshape(b, t)
    if bias is not None:
        eij = eij + bias
    eij = jnp.tanh(eij)
    a = jnp.exp(eij)
    if mask is not None:
        a = a * mask
    a = a / jnp.sum(a, axis=1, keepdims=True) + 1e-10
    return jnp.sum(xf * a[:, :, None], axis=1)


if __name__ == "__main__":
    key = jax.random.PRNGKey(0)
    k1, k2, k3, k4, k5, k6 = jax.random.split(key, 6)

    # Test 1: module toy shape (batch=2, step=8, feature=32), f32, bias.
    B, T, F = 2, 8, 32
    x = jax.random.normal(k1, (B, T, F), dtype=jnp.float32)
    limit = (6.0 / (F + 1)) ** 0.5
    w = jax.random.uniform(k2, (F, 1), minval=-limit, maxval=limit, dtype=jnp.float32)
    bias = 0.01 * jnp.arange(T, dtype=jnp.float32)
    out = jax.block_until_ready(attention_forward(x, w, bias))
    assert out.shape == (B, F)
    assert jnp.allclose(out, reference(x, w, bias), atol=1e-4, rtol=1e-4), "mismatch (small)"

    # Test 2: multi-step grid (B=16 -> 2 parallel grid steps), lane-dense F=128.
    B2, T2, F2 = 16, 16, 128
    x2 = jax.random.normal(k3, (B2, T2, F2), dtype=jnp.float32)
    limit2 = (6.0 / (F2 + 1)) ** 0.5
    w2 = jax.random.uniform(k4, (F2, 1), minval=-limit2, maxval=limit2, dtype=jnp.float32)
    bias2 = 0.01 * jnp.arange(T2, dtype=jnp.float32)
    out2 = jax.block_until_ready(attention_forward(x2, w2, bias2))
    assert out2.shape == (B2, F2)
    assert jnp.allclose(out2, reference(x2, w2, bias2), atol=1e-4, rtol=1e-4), "mismatch (tiled)"

    # Test 3: bf16 transport (native dtype over HBM, f32 in-kernel), batch not a
    # multiple of 8 (B=12 -> padded to 16), and an attention mask.
    B3, T3, F3 = 12, 16, 128
    x3 = jax.random.normal(k5, (B3, T3, F3), dtype=jnp.float32).astype(jnp.bfloat16)
    limit3 = (6.0 / (F3 + 1)) ** 0.5
    w3 = jax.random.uniform(k6, (F3, 1), minval=-limit3, maxval=limit3, dtype=jnp.float32)
    bias3 = 0.01 * jnp.arange(T3, dtype=jnp.float32)
    mask3 = jnp.ones((B3, T3), jnp.float32).at[:, ::4].set(0.0)
    out3 = jax.block_until_ready(attention_forward(x3, w3, bias3, mask=mask3))
    assert out3.shape == (B3, F3)
    assert jnp.allclose(out3, reference(x3, w3, bias3, mask=mask3),
                        atol=1e-4, rtol=1e-4), "mismatch (bf16/masked/padded)"

    print("KERNEL_OK")
</pallas_src>

<mosaic_0001>
module attributes {stable_mosaic.version = 11 : i64} {
  func.func @attention_kernel(%arg0: i32, %arg1: memref<8x8x32xf32, #tpu.memory_space<vmem>>, %arg2: memref<1x32xf32, #tpu.memory_space<vmem>>, %arg3: memref<1x8xf32, #tpu.memory_space<vmem>>, %arg4: memref<8x32xf32, #tpu.memory_space<vmem>>) attributes {dimension_semantics = [#tpu.dimension_semantics<parallel>], iteration_bounds = array<i64: 1>, scalar_prefetch = 0 : i64, scratch_operands = 0 : i64, tpu.core_type = #tpu.core_type<tc>, window_params = [{transform_indices = @transform_0, window_bounds = array<i64: 8, 8, 32>}, {pipeline_mode = #tpu.pipeline_mode<synchronous>, transform_indices = @transform_1, window_bounds = array<i64: 1, 32>}, {pipeline_mode = #tpu.pipeline_mode<synchronous>, transform_indices = @transform_2, window_bounds = array<i64: 1, 8>}, {transform_indices = @transform_3, window_bounds = array<i64: 8, 32>}]} {
    %c0 = arith.constant 0 : index
    %c0_0 = arith.constant 0 : index
    %c0_1 = arith.constant 0 : index
    %0 = vector.load %arg1[%c0, %c0_0, %c0_1] : memref<8x8x32xf32, #tpu.memory_space<vmem>>, vector<8x8x32xf32>
    %c0_2 = arith.constant 0 : index
    %c0_3 = arith.constant 0 : index
    %1 = vector.load %arg2[%c0_2, %c0_3] : memref<1x32xf32, #tpu.memory_space<vmem>>, vector<1x32xf32>
    %c0_4 = arith.constant 0 : index
    %c0_5 = arith.constant 0 : index
    %2 = vector.load %arg3[%c0_4, %c0_5] : memref<1x8xf32, #tpu.memory_space<vmem>>, vector<1x8xf32>
    %3 = vector.shape_cast %1 : vector<1x32xf32> to vector<1x1x32xf32>
    %4 = vector.broadcast %3 : vector<1x1x32xf32> to vector<8x8x32xf32>
    %5 = arith.mulf %0, %4 : vector<8x8x32xf32>
    %cst = arith.constant dense<0.000000e+00> : vector<8x8xf32>
    %6 = vector.multi_reduction <add>, %5, %cst [2] : vector<8x8x32xf32> to vector<8x8xf32>
    %7 = vector.broadcast %2 : vector<1x8xf32> to vector<8x8xf32>
    %8 = arith.addf %6, %7 : vector<8x8xf32>
    %9 = math.tanh %8 : vector<8x8xf32>
    %10 = math.exp %9 : vector<8x8xf32>
    %cst_6 = arith.constant dense<0.000000e+00> : vector<8xf32>
    %11 = vector.multi_reduction <add>, %10, %cst_6 [1] : vector<8x8xf32> to vector<8xf32>
    %12 = vector.shape_cast %11 : vector<8xf32> to vector<8x1xf32>
    %13 = vector.broadcast %12 : vector<8x1xf32> to vector<8x8xf32>
    %14 = arith.divf %10, %13 : vector<8x8xf32>
    %cst_7 = arith.constant 1.000000e-10 : f32
    %15 = vector.broadcast %cst_7 : f32 to vector<8x8xf32>
    %16 = arith.addf %14, %15 : vector<8x8xf32>
    %17 = vector.shape_cast %16 : vector<8x8xf32> to vector<8x8x1xf32>
    %18 = vector.broadcast %17 : vector<8x8x1xf32> to vector<8x8x32xf32>
    %19 = arith.mulf %0, %18 : vector<8x8x32xf32>
    %cst_8 = arith.constant dense<0.000000e+00> : vector<8x32xf32>
    %20 = vector.multi_reduction <add>, %19, %cst_8 [1] : vector<8x8x32xf32> to vector<8x32xf32>
    %c0_9 = arith.constant 0 : index
    %c0_10 = arith.constant 0 : index
    %21 = vector.load %arg4[%c0_9, %c0_10] : memref<8x32xf32, #tpu.memory_space<vmem>>, vector<8x32xf32>
    tpu.vector_store %arg4[%c0_9, %c0_10], %20 {strides = array<i32>} : memref<8x32xf32, #tpu.memory_space<vmem>>, vector<8x32xf32>,
    return
  }
  func.func @transform_0(%arg0: i32) -> (i32, i32, i32) {
    %c0_i32 = arith.constant 0 : i32
    %c0_i32_0 = arith.constant 0 : i32
    %c0_i32_1 = arith.constant 0 : i32
    return %arg0, %c0_i32, %c0_i32_0 : i32, i32, i32
  }
  func.func @transform_1(%arg0: i32) -> (i32, i32) {
    %c0_i32 = arith.constant 0 : i32
    %c0_i32_0 = arith.constant 0 : i32
    %c0_i32_1 = arith.constant 0 : i32
    return %c0_i32, %c0_i32_0 : i32, i32
  }
  func.func @transform_2(%arg0: i32) -> (i32, i32) {
    %c0_i32 = arith.constant 0 : i32
    %c0_i32_0 = arith.constant 0 : i32
    %c0_i32_1 = arith.constant 0 : i32
    return %c0_i32, %c0_i32_0 : i32, i32
  }
  func.func @transform_3(%arg0: i32) -> (i32, i32) {
    %c0_i32 = arith.constant 0 : i32
    %c0_i32_0 = arith.constant 0 : i32
    return %arg0, %c0_i32 : i32, i32
  }
}

</mosaic_0001>

<bundles_post_ra>
// kernel: tpu_custom_call.1
= control target key start
LH: loop header
LB: loop body
LE: loop exit
PB: predicated region body
PF: predicated region fallthrough
CT: control target
= control target key end

     0   :  { %8 = vsyncpa [#allocation3], 0  ;;  %s667_s0 = inlined_call_operand.hbm [shape: f32[8,8,32], index: 0, kind: input, shape index: {}]   ;;  %s668_s1 = inlined_call_operand.vmem [shape: f32[1,32], index: 1, kind: input, shape index: {}]   ;;  %s669_s2 = inlined_call_operand.vmem [shape: f32[1,8], index: 2, kind: input, shape index: {}]   ;;  %s670_s3 = inlined_call_operand.hbm [shape: f32[8,32], index: 3, kind: output, shape index: {}]  }
   0x1   :  { %9 = vsyncpa [#allocation4], 0  ;;  %s510_s12 = smov [#allocation2]   ;;  %s462_s16 = scalar_lea.hbm %s667_s0, 1024 }
   0x2   :  { %s15_s13 = sshll.u32 %s510_s12, 4  ;;  %p463_p0 = scmp.ne.s32.totalorder %s667_s0, %s462_s16  ;;  %s16_s13 = int_to_ptr.vmem [resolvable:$true] %s15_s13 }
   0x3   :  { %p466_p1 = scmp.lt.u32.totalorder %s462_s16, %s667_s0 }
   0x5   :  { %p468_p2 = pnand %p466_p1, %p463_p0 }
   0x7   :  { %471 = shalt.err (!%p468_p2)
}
   0x8   :  { %s472_s21 = scalar_lea.vmem %s16_s13, 1024  ;;  %p477_p4 = scmp.lt.s32.totalorder %s16_s13, %s16_s13 }
   0x9   :  { %p473_p3 = scmp.ne.s32.totalorder %s16_s13, %s472_s21  ;;  %p478_p5 = scmp.lt.s32.totalorder %s472_s21, %s472_s21 }
   0xb   :  { %p479_p6 = por %p478_p5, %p477_p4 }
   0xd   :  { %p480_p7 = pnand %p479_p6, %p473_p3 }
   0xf   :  { %483 = shalt.err (!%p480_p7)
}
  0x10   :  { %s511_s22 = smov 128   ;;  %s512_s23 = smov 8  }
  0x11   :  { %21 = dma.hbm_to_vmem [thread:$0]  %s667_s0, 1024, %s16_s13, [#allocation3], %s511_s22, %s511_s22, %s512_s23  }
  0x12   :  { %506 = dma.done.wait [#allocation3], 1024  }
  0x13   :  { %507 = vsyncadd [#allocation3], 4294966272  ;;  %v547_v0 = vld [vmem:[#allocation2] sm:$0xff]  ;;  %vm53_vm0 = vcmask 261120   ;;  %v552_v2 = vld [vmem:[#allocation2 + $0x10] sm:$0xff]  ;;  %v513_v26 = vmov 0  }
  0x14   :  { %v405_v1 = vld [vmem:[%s668_s1] ss:$0 sm:$0xff]  ;;  %v556_v5 = vld [vmem:[#allocation2 + $0x8] sm:$0xff]  ;;  %v558_v6 = vld [vmem:[#allocation2 + $0x18] sm:$0xff]  ;;  %413 = vset.pattern.permute.xlu0 %v513_v26  ;;  %412 = vset.pattern.permute.xlu1 %v513_v26  ;;  %vm185_vm1 = vcmask 1041409   ;;  %vm187_vm2 = vcmask 1042434  }
  0x15   :  { %v45_v3 = vmul.f32 %v405_v1, %v547_v0  ;;  %v47_v4 = vmul.f32 %v405_v1, %v552_v2  ;;  %v46_v7 = vmul.f32 %v405_v1, %v556_v5  ;;  %v48_v8 = vmul.f32 %v405_v1, %v558_v6  ;;  %v562_v9 = vld [vmem:[#allocation2 + $0x20] sm:$0xff]  ;;  %v564_v10 = vld [vmem:[#allocation2 + $0x28] sm:$0xff]  ;;  %v572_v17 = vld [vmem:[#allocation2 + $0x30] sm:$0xff] }
  0x16   :  { %v49_v15 = vmul.f32 %v405_v1, %v562_v9  ;;  %v50_v16 = vmul.f32 %v405_v1, %v564_v10  ;;  %v574_v18 = vld [vmem:[#allocation2 + $0x38] sm:$0xff]  ;;  %v51_v21 = vmul.f32 %v405_v1, %v572_v17  ;;  %v406_v25 = vld [vmem:[%s669_s2] ss:$0 sm:$0xff]  ;;  %vm189_vm3 = vcmask 1043459   ;;  %s514_s2 = smov [#allocation5]  }
  0x17   :  { %v54_v11 = vsel %vm53_vm0, %v45_v3, 0.0  ;;  %v60_v12 = vsel %vm53_vm0, %v47_v4, 0.0  ;;  %v57_v13 = vsel %vm53_vm0, %v46_v7, 0.0  ;;  %v63_v14 = vsel %vm53_vm0, %v48_v8, 0.0  ;;  %s396_s28 = sshll.u32 %s514_s2, 4  ;;  %s397_s28 = int_to_ptr.vmem [resolvable:$true] %s396_s28 }
  0x18   :  { %55 = vadd.xlane.f32.xlu0 %v54_v11  ;;  %61 = vadd.xlane.f32.xlu1 %v60_v12  ;;  %v66_v19 = vsel %vm53_vm0, %v49_v15, 0.0  ;;  %v69_v20 = vsel %vm53_vm0, %v50_v16, 0.0  ;;  %v52_v22 = vmul.f32 %v405_v1, %v574_v18  ;;  %v72_v23 = vsel %vm53_vm0, %v51_v21, 0.0  ;;  %s484_s29 = scalar_lea.vmem %s397_s28, 128  ;;  %p489_p9 = scmp.lt.s32.totalorder %s397_s28, %s397_s28 }
  0x19   :  { %v151_v8 = vlaneseq  ;;  %vm191_vm4 = vcmask 1044484   ;;  %vm193_vm5 = vcmask 1045509   ;;  %vm195_vm6 = vcmask 1046534   ;;  %p485_p8 = scmp.ne.s32.totalorder %s397_s28, %s484_s29  ;;  %p490_p10 = scmp.lt.s32.totalorder %s484_s29, %s484_s29 }
  0x1a   :  { %v75_v24 = vsel %vm53_vm0, %v52_v22, 0.0  ;;  %vm197_vm7 = vcmask 1047559   ;;  %vm200_vm8 = vcmask 64512  }
  0x1b   :  { %v152_v12 = vand.u32 127, %v151_v8  ;;  %p491_p11 = por %p490_p10, %p489_p9 }
  0x1c   :  { %58 = vadd.xlane.f32.xlu0 %v57_v13  ;;  %64 = vadd.xlane.f32.xlu1 %v63_v14  ;;  %v606_v13 = vshrl.u32 %v151_v8, 7 }
  0x1d   :  { %p492_p12 = pnand %p491_p11, %p485_p8 }
  0x1e   :  { %v155_v15 = vsub.s32 %v152_v12, %v606_v13 }
  0x20   :  { %67 = vadd.xlane.f32.xlu0 %v66_v19  ;;  %70 = vadd.xlane.f32.xlu1 %v69_v20 }
  0x24   :  { %73 = vadd.xlane.f32.xlu0 %v72_v23  ;;  %76 = vadd.xlane.f32.xlu1 %v75_v24 }
  0x3a   :  { %84 = vbcast.lane.b32.xlu0 %v406_v25, 256 }
  0xa5   :  { %v56_v27 = vpop.xlane.xlu0 %55  ;;  %v62_v30 = vpop.xlane.xlu1 %61 }
  0xa9   :  { %v59_v28 = vpop.xlane.xlu0 %58  ;;  %v65_v32 = vpop.xlane.xlu1 %64 }
  0xad   :  { %v68_v29 = vpop.xlane.xlu0 %67  ;;  %v71_v38 = vpop.xlane.xlu1 %70 }
  0xb1   :  { %v74_v31 = vpop.xlane.xlu0 %73  ;;  %v77_v41 = vpop.xlane.xlu1 %76 }
  0xb5   :  { %v85_v33 = vpop.permute.xlu0 %84 }
  0xb6   :  { %v87_v34 = vadd.f32 %v85_v33, %v56_v27  ;;  %v88_v35 = vadd.f32 %v85_v33, %v59_v28  ;;  %v90_v36 = vadd.f32 %v85_v33, %v65_v32  ;;  %v89_v37 = vadd.f32 %v85_v33, %v62_v30 }
  0xb7   :  { %v93_v39 = vadd.f32 %v85_v33, %v74_v31  ;;  %v91_v40 = vadd.f32 %v85_v33, %v68_v29  ;;  %v92_v42 = vadd.f32 %v85_v33, %v71_v38  ;;  %v94_v45 = vadd.f32 %v85_v33, %v77_v41 }
  0xb8   :  { %414 = vtanh.f32 %v87_v34  ;;  %v207_v41 = vsub.s32 0, %v606_v13 }
  0xb9   :  { %416 = vtanh.f32 %v88_v35 }
  0xba   :  { %418 = vtanh.f32 %v90_v36 }
  0xbb   :  { %420 = vtanh.f32 %v89_v37 }
  0xbc   :  { %422 = vtanh.f32 %v93_v39 }
  0xbd   :  { %424 = vtanh.f32 %v91_v40  ;;  %v235_v40 = vsub.s32 7, %v606_v13 }
  0xbe   :  { %426 = vtanh.f32 %v92_v42  ;;  %v211_v42 = vsub.s32 1, %v606_v13 }
  0xc2   :  { %v415_v43 = vpop.eup %414 }
  0xc3   :  { %v417_v44 = vpop.eup %416  ;;  %v103_v46 = vmul.f32 1.442695, %v415_v43 }
  0xc4   :  { %v419_v47 = vpop.eup %418  ;;  %v105_v48 = vmul.f32 1.442695, %v417_v44  ;;  %v215_v44 = vsub.s32 2, %v606_v13 }
  0xc5   :  { %428 = vpow2.f32 %v103_v46  ;;  %v421_v49 = vpop.eup %420  ;;  %v109_v50 = vmul.f32 1.442695, %v419_v47 }
  0xc6   :  { %430 = vtanh.f32 %v94_v45  ;;  %v423_v51 = vpop.eup %422  ;;  %v107_v52 = vmul.f32 1.442695, %v421_v49  ;;  %v219_v49 = vsub.s32 3, %v606_v13 }
  0xc7   :  { %432 = vpow2.f32 %v109_v50  ;;  %v115_v53 = vmul.f32 1.442695, %v423_v51  ;;  %v425_v54 = vpop.eup %424  ;;  %v223_v51 = vsub.s32 4, %v606_v13 }
  0xc8   :  { %434 = vpow2.f32 %v105_v48  ;;  %v111_v55 = vmul.f32 1.442695, %v425_v54  ;;  %v427_v56 = vpop.eup %426 }
  0xc9   :  { %436 = vpow2.f32 %v115_v53  ;;  %v113_v59 = vmul.f32 1.442695, %v427_v56  ;;  %v227_v53 = vsub.s32 5, %v606_v13 }
  0xca   :  { %438 = vpow2.f32 %v107_v52 }
  0xcb   :  { %440 = vpow2.f32 %v111_v55 }
  0xcc   :  { %442 = vpow2.f32 %v113_v59 }
  0xcf   :  { %v585_v57 = vpop.eup %428 }
  0xd0   :  { %128 = vperm.xlu1 %412, %v585_v57   ;;  %v431_v58 = vpop.eup %430 }
  0xd1   :  { %v588_v60 = vpop.eup %432  ;;  %v117_v62 = vmul.f32 1.442695, %v431_v58 }
  0xd2   :  { %v590_v61 = vpop.eup %434  ;;  %137 = vperm.xlu0 %413, %v588_v60  }
  0xd3   :  { %v594_v63 = vpop.eup %436  ;;  %444 = vpow2.f32 %v117_v62 }
  0xd4   :  { %131 = vperm.xlu1 %412, %v590_v61   ;;  %v596_v1 = vpop.eup %438 }
  0xd5   :  { %v600_v3 = vpop.eup %440 }
  0xd6   :  { %146 = vperm.xlu0 %413, %v594_v63   ;;  %v603_v4 = vpop.eup %442 }
  0xd8   :  { %134 = vperm.xlu1 %412, %v596_v1  }
  0xdc   :  { %140 = vperm.xlu1 %412, %v600_v3  }
  0xdd   :  { %v445_v7 = vpop.eup %444 }
  0xe0   :  { %143 = vperm.xlu1 %412, %v603_v4  }
  0xe4   :  { %149 = vperm.xlu1 %412, %v445_v7  }
 0x14f   :  { %v129_v11 = vpop.permute.xlu1 %128 }
 0x150   :  { %v156_v22 = vrot.slane %v129_v11, %v155_v15  ;;  %v231_v11 = vsub.s32 6, %v606_v13 }
 0x151   :  { %v138_v21 = vpop.permute.xlu0 %137 }
 0x152   :  { %v168_v27 = vrot.slane %v138_v21, %v155_v15 }
 0x153   :  { %v132_v14 = vpop.permute.xlu1 %131 }
 0x154   :  { %v160_v19 = vrot.slane %v132_v14, %v155_v15 }
 0x155   :  { %v147_v29 = vpop.permute.xlu0 %146 }
 0x156   :  { %v186_v24 = vsel %vm185_vm1, %v160_v19, %v156_v22  ;;  %v180_v34 = vrot.slane %v147_v29, %v155_v15 }
 0x157   :  { %v135_v16 = vpop.permute.xlu1 %134 }
 0x158   :  { %v164_v20 = vrot.slane %v135_v16, %v155_v15 }
 0x15a   :  { %v188_v25 = vsel %vm187_vm2, %v164_v20, %v186_v24 }
 0x15b   :  { %v141_v23 = vpop.permute.xlu1 %140  ;;  %v190_v30 = vsel %vm189_vm3, %v168_v27, %v188_v25 }
 0x15c   :  { %v172_v26 = vrot.slane %v141_v23, %v155_v15 }
 0x15e   :  { %v192_v32 = vsel %vm191_vm4, %v172_v26, %v190_v30 }
 0x15f   :  { %v144_v28 = vpop.permute.xlu1 %143 }
 0x160   :  { %v176_v31 = vrot.slane %v144_v28, %v155_v15 }
 0x162   :  { %v194_v33 = vsel %vm193_vm5, %v176_v31, %v192_v32 }
 0x163   :  { %v150_v35 = vpop.permute.xlu1 %149  ;;  %v196_v37 = vsel %vm195_vm6, %v180_v34, %v194_v33 }
 0x164   :  { %v184_v36 = vrot.slane %v150_v35, %v155_v15 }
 0x166   :  { %v198_v38 = vsel %vm197_vm7, %v184_v36, %v196_v37 }
 0x167   :  { %v201_v39 = vsel %vm200_vm8, %v198_v38, 0.0 }
 0x168   :  { %202 = vadd.xlane.f32.xlu0 %v201_v39 }
 0x1f5   :  { %v203_v43 = vpop.xlane.xlu0 %202 }
 0x1f6   :  { %v236_v45 = vrot.slane %v203_v43, %v235_v40  ;;  %v208_v46 = vrot.slane %v203_v43, %v207_v41  ;;  %v212_v47 = vrot.slane %v203_v43, %v211_v42  ;;  %v216_v48 = vrot.slane %v203_v43, %v215_v44 }
 0x1f7   :  { %v220_v50 = vrot.slane %v203_v43, %v219_v49  ;;  %v224_v52 = vrot.slane %v203_v43, %v223_v51  ;;  %v228_v8 = vrot.slane %v203_v43, %v227_v53  ;;  %v232_v16 = vrot.slane %v203_v43, %v231_v11 }
 0x1f8   :  { %446 = vrcp.f32 %v236_v45 }
 0x1f9   :  { %448 = vrcp.f32 %v208_v46 }
 0x1fa   :  { %450 = vrcp.f32 %v212_v47 }
 0x1fb   :  { %452 = vrcp.f32 %v216_v48 }
 0x1fc   :  { %454 = vrcp.f32 %v220_v50 }
 0x1fd   :  { %456 = vrcp.f32 %v224_v52 }
 0x1fe   :  { %458 = vrcp.f32 %v228_v8 }
 0x1ff   :  { %460 = vrcp.f32 %v232_v16 }
 0x202   :  { %v447_v54 = vpop.eup %446 }
 0x203   :  { %v449_v55 = vpop.eup %448  ;;  %v260_v56 = vmul.f32 %v447_v54, %v445_v7 }
 0x204   :  { %v451_v58 = vpop.eup %450  ;;  %v246_v59 = vmul.f32 %v449_v55, %v585_v57 }
 0x205   :  { %v268_v62 = vadd.f32 1e-10, %v260_v56  ;;  %v248_v14 = vmul.f32 %v451_v58, %v590_v61  ;;  %v453_v15 = vpop.eup %452 }
 0x206   :  { %v261_v12 = vadd.f32 1e-10, %v246_v59  ;;  %v250_v20 = vmul.f32 %v453_v15, %v596_v1  ;;  %v455_v7 = vpop.eup %454 }
 0x207   :  { %306 = vperm.xlu0 %413, %v268_v62   ;;  %v262_v19 = vadd.f32 1e-10, %v248_v14  ;;  %v252_v21 = vmul.f32 %v455_v7, %v588_v60  ;;  %v457_v22 = vpop.eup %456 }
 0x208   :  { %271 = vperm.xlu1 %412, %v261_v12   ;;  %v263_v57 = vadd.f32 1e-10, %v250_v20  ;;  %v254_v23 = vmul.f32 %v457_v22, %v600_v3  ;;  %v459_v61 = vpop.eup %458 }
 0x209   :  { %v264_v13 = vadd.f32 1e-10, %v252_v21  ;;  %v256_v25 = vmul.f32 %v459_v61, %v603_v4  ;;  %v461_v26 = vpop.eup %460 }
 0x20a   :  { %v265_v24 = vadd.f32 1e-10, %v254_v23  ;;  %v258_v1 = vmul.f32 %v461_v26, %v594_v63 }
 0x20b   :  { %v266_v27 = vadd.f32 1e-10, %v256_v25 }
 0x20c   :  { %276 = vperm.xlu1 %412, %v262_v19   ;;  %v267_v28 = vadd.f32 1e-10, %v258_v1 }
 0x210   :  { %281 = vperm.xlu1 %412, %v263_v57  }
 0x214   :  { %286 = vperm.xlu1 %412, %v264_v13  }
 0x218   :  { %291 = vperm.xlu1 %412, %v265_v24  }
 0x21c   :  { %296 = vperm.xlu1 %412, %v266_v27  }
 0x220   :  { %301 = vperm.xlu1 %412, %v267_v28  }
 0x286   :  { %v307_v33 = vpop.permute.xlu0 %306 }
 0x287   :  { %v272_v29 = vpop.permute.xlu1 %271  ;;  %v316_v36 = vmul.f32 %v307_v33, %v574_v18 }
 0x288   :  { %v309_v31 = vmul.f32 %v272_v29, %v547_v0 }
 0x289   :  { %v366_v41 = vsel %vm53_vm0, %v316_v36, 0.0 }
 0x28a   :  { %v317_v34 = vsel %vm53_vm0, %v309_v31, 0.0  ;;  %v367_v47 = vrot.slane %v366_v41, 4 }
 0x28b   :  { %v277_v60 = vpop.permute.xlu1 %276  ;;  %v318_v39 = vrot.slane %v317_v34, 4 }
 0x28c   :  { %v310_v30 = vmul.f32 %v277_v60, %v556_v5  ;;  %v368_v55 = vadd.f32 %v367_v47, %v366_v41 }
 0x28d   :  { %v319_v44 = vadd.f32 %v318_v39, %v317_v34 }
 0x28e   :  { %v324_v3 = vsel %vm53_vm0, %v310_v30, 0.0  ;;  %v369_v19 = vrot.slane %v368_v55, 2 }
 0x28f   :  { %v282_v32 = vpop.permute.xlu1 %281  ;;  %v325_v35 = vrot.slane %v324_v3, 4 }
 0x290   :  { %v311_v4 = vmul.f32 %v282_v32, %v552_v2  ;;  %v370_v25 = vadd.f32 %v369_v19, %v368_v55 }
 0x291   :  { %v326_v40 = vadd.f32 %v325_v35, %v324_v3 }
 0x292   :  { %v331_v63 = vsel %vm53_vm0, %v311_v4, 0.0  ;;  %v371_v31 = vrot.slane %v370_v25, 1 }
 0x293   :  { %v332_v37 = vrot.slane %v331_v63, 4  ;;  %v287_v38 = vpop.permute.xlu1 %286  ;;  %v327_v48 = vrot.slane %v326_v40, 2 }
 0x294   :  { %v312_v5 = vmul.f32 %v287_v38, %v558_v6  ;;  %v320_v6 = vrot.slane %v319_v44, 2  ;;  %v372_v36 = vadd.f32 %v371_v31, %v370_v25 }
 0x295   :  { %v333_v42 = vadd.f32 %v332_v37, %v331_v63  ;;  %v328_v56 = vadd.f32 %v327_v48, %v326_v40 }
 0x296   :  { %v338_v0 = vsel %vm53_vm0, %v312_v5, 0.0  ;;  %v321_v11 = vadd.f32 %v320_v6, %v319_v44 }
 0x297   :  { %v339_v43 = vrot.slane %v338_v0, 4  ;;  %v292_v2 = vpop.permute.xlu1 %291  ;;  %v334_v49 = vrot.slane %v333_v42, 2  ;;  %v329_v20 = vrot.slane %v328_v56, 1 }
 0x298   :  { %v313_v45 = vmul.f32 %v292_v2, %v562_v9  ;;  %v322_v22 = vrot.slane %v321_v11, 1 }
 0x299   :  { %v340_v46 = vadd.f32 %v339_v43, %v338_v0  ;;  %v335_v59 = vadd.f32 %v334_v49, %v333_v42  ;;  %v330_v26 = vadd.f32 %v329_v20, %v328_v56 }
 0x29a   :  { %v345_v18 = vsel %vm53_vm0, %v313_v45, 0.0 }
 0x29b   :  { %v346_v50 = vrot.slane %v345_v18, 4  ;;  %v297_v51 = vpop.permute.xlu1 %296  ;;  %v341_v52 = vrot.slane %v340_v46, 2 }
 0x29c   :  { %v314_v53 = vmul.f32 %v297_v51, %v564_v10  ;;  %v336_v10 = vrot.slane %v335_v59, 1 }
 0x29d   :  { %v347_v54 = vadd.f32 %v346_v50, %v345_v18  ;;  %v342_v12 = vadd.f32 %v341_v52, %v340_v46 }
 0x29e   :  { %v352_v58 = vsel %vm53_vm0, %v314_v53, 0.0  ;;  %v337_v27 = vadd.f32 %v336_v10, %v335_v59 }
 0x29f   :  { %v348_v62 = vrot.slane %v347_v54, 2  ;;  %v353_v9 = vrot.slane %v352_v58, 4  ;;  %v302_v8 = vpop.permute.xlu1 %301  ;;  %v343_v13 = vrot.slane %v342_v12, 1 }
 0x2a0   :  { %v315_v14 = vmul.f32 %v302_v8, %v572_v17  ;;  %v323_v17 = vadd.f32 %v322_v22, %v321_v11 }
 0x2a1   :  { %v349_v15 = vadd.f32 %v348_v62, %v347_v54  ;;  %v354_v16 = vadd.f32 %v353_v9, %v352_v58  ;;  %v344_v29 = vadd.f32 %v343_v13, %v342_v12 }
 0x2a2   :  { %v359_v7 = vsel %vm53_vm0, %v315_v14, 0.0  ;;  %v381_v3 = vsel %vm185_vm1, %v330_v26, %v323_v17 }
 0x2a3   :  { %v355_v57 = vrot.slane %v354_v16, 2  ;;  %v360_v21 = vrot.slane %v359_v7, 4  ;;  %v350_v23 = vrot.slane %v349_v15, 1  ;;  %v382_v33 = vsel %vm187_vm2, %v337_v27, %v381_v3 }
 0x2a4   :  { %v383_v34 = vsel %vm189_vm3, %v344_v29, %v382_v33 }
 0x2a5   :  { %v356_v61 = vadd.f32 %v355_v57, %v354_v16  ;;  %v361_v24 = vadd.f32 %v360_v21, %v359_v7  ;;  %v351_v60 = vadd.f32 %v350_v23, %v349_v15 }
 0x2a7   :  { %v357_v1 = vrot.slane %v356_v61, 1  ;;  %v362_v28 = vrot.slane %v361_v24, 2  ;;  %v384_v63 = vsel %vm191_vm4, %v351_v60, %v383_v34 }
 0x2a9   :  { %v363_v30 = vadd.f32 %v362_v28, %v361_v24  ;;  %v358_v32 = vadd.f32 %v357_v1, %v356_v61 }
 0x2ab   :  { %v364_v4 = vrot.slane %v363_v30, 1  ;;  %v385_v37 = vsel %vm193_vm5, %v358_v32, %v384_v63 }
 0x2ad   :  { %v365_v35 = vadd.f32 %v364_v4, %v363_v30 }
 0x2af   :  { %v386_v38 = vsel %vm195_vm6, %v365_v35, %v385_v37 }
 0x2b0   :  { %v387_v39 = vsel %vm197_vm7, %v372_v36, %v386_v38 }
 0x2b1   :  { %389 = vst.msk [vmem:[#allocation5] sm:$0xff] %vm53_vm0, %v387_v39 }
 0x2b2   :  { %495 = shalt.err (!%p492_p12)
}
 0x2b3   :  { %s496_s5 = scalar_lea.hbm %s670_s3, 128 }
 0x2b4   :  { %p497_p13 = scmp.ne.s32.totalorder %s670_s3, %s496_s5  ;;  %p500_p0 = scmp.lt.u32.totalorder %s496_s5, %s670_s3 }
 0x2b6   :  { %p502_p1 = pnand %p500_p0, %p497_p13 }
 0x2b8   :  { %505 = shalt.err (!%p502_p1)
}
 0x2b9   :  { %399 = dma.vmem_to_hbm [thread:$0]  %s397_s28, 128, %s670_s3, [#allocation4]  }
 0x2ba   :  { %508 = dma.done.wait [#allocation4], 128  }
 0x2bb   :  { %509 = vsyncadd [#allocation4], 4294967168 }
 0x2bc   :  { %403 = vsyncpa [#allocation3], 1 }
 0x2bd   :  { %404 = vsyncpa [#allocation4], 1 }

</bundles_post_ra>
